<compile_context>
chip_gen: v7x
topology: tpu7x:2x2x1
jax: 0.10.0
libtpu: 0.0.40
codegen_flags: <defaults>
</compile_context>

<pallas_src>
import functools

import jax
import jax.numpy as jnp
from jax.experimental import pallas as pl
from jax.experimental.pallas import tpu as pltpu

VMEM_LIMIT = 40 * 1024 * 1024            # portable across v5e/v6e/v7x
DIRECT_CONV_VMEM_BUDGET = 24 * 1024 * 1024


def _round_up(x, m):
    return (x + m - 1) // m * m


def _pick_tn(np_):
    # Np is always a multiple of 128 (pre-padded at init).
    return 256 if np_ % 256 == 0 else 128


# ----------------------------------------------------------------------------
# Pallas kernel 1: tiled matmul (bf16 x bf16 -> f32 acc) with fused
#   per-column BN affine, optional residual add, optional ReLU.
#   O = act((X @ W) * scale + bias [+ res])
# ----------------------------------------------------------------------------
def _mm_affine_kernel(x_ref, w_ref, s_ref, b_ref, *rest, relu, has_res):
    if has_res:
        r_ref, o_ref, acc_ref = rest
    else:
        o_ref, acc_ref = rest
    kk = pl.program_id(2)

    @pl.when(kk == 0)
    def _():
        acc_ref[...] = jnp.zeros_like(acc_ref)

    acc_ref[...] += jnp.dot(x_ref[...], w_ref[...],
                            preferred_element_type=jnp.float32)

    @pl.when(kk == pl.num_programs(2) - 1)
    def _():
        y = acc_ref[...] * s_ref[...] + b_ref[...]
        if has_res:
            y = y + r_ref[...].astype(jnp.float32)
        if relu:
            y = jnp.maximum(y, 0.0)
        o_ref[...] = y.astype(o_ref.dtype)


def matmul_affine(x, w, scale, bias, *, relu, res=None, out_dtype=jnp.bfloat16):
    """x: (M, K). w: (K, Np) bf16 (Np pre-padded). scale/bias: (1, Np) f32."""
    M, K = x.shape
    K2, Np = w.shape
    assert K2 == K
    xb = x.astype(jnp.bfloat16)

    # K handling: pad only the rare non-8-aligned case (stem conv im2col K=27).
    Kp = K if K % 8 == 0 else _round_up(K, 128)
    if Kp != K:
        xb = jnp.pad(xb, ((0, 0), (0, Kp - K)))
        w = jnp.pad(w, ((0, Kp - K), (0, 0)))
    if Kp <= 2048:
        tk = Kp
    elif Kp % 1024 == 0:
        tk = 1024
    elif Kp % 512 == 0:
        tk = 512
    else:
        tk = 512
        Kp2 = _round_up(Kp, 512)
        xb = jnp.pad(xb, ((0, 0), (0, Kp2 - Kp)))
        w = jnp.pad(w, ((0, Kp2 - Kp), (0, 0)))
        Kp = Kp2

    tm = 256 if M >= 256 else _round_up(M, 8)
    tn = _pick_tn(Np)
    Mp = _round_up(M, tm)
    if Mp != M:
        xb = jnp.pad(xb, ((0, Mp - M), (0, 0)))

    inputs = [xb, w, scale, bias]
    in_specs = [
        pl.BlockSpec((tm, tk), lambda i, j, k: (i, k)),
        pl.BlockSpec((tk, tn), lambda i, j, k: (k, j)),
        pl.BlockSpec((1, tn), lambda i, j, k: (0, j)),
        pl.BlockSpec((1, tn), lambda i, j, k: (0, j)),
    ]
    has_res = res is not None
    if has_res:
        rb = res.astype(jnp.bfloat16)
        if rb.shape[1] != Np:
            rb = jnp.pad(rb, ((0, 0), (0, Np - rb.shape[1])))
        if Mp != M:
            rb = jnp.pad(rb, ((0, Mp - M), (0, 0)))
        inputs.append(rb)
        in_specs.append(pl.BlockSpec((tm, tn), lambda i, j, k: (i, j)))

    grid = (Mp // tm, Np // tn, Kp // tk)
    out_itemsize = jnp.dtype(out_dtype).itemsize
    cost = pl.CostEstimate(
        flops=2 * Mp * Np * Kp,
        transcendentals=0,
        bytes_accessed=(Mp * Kp + Kp * Np) * 2 + Mp * Np * out_itemsize)

    out = pl.pallas_call(
        functools.partial(_mm_affine_kernel, relu=relu, has_res=has_res),
        out_shape=jax.ShapeDtypeStruct((Mp, Np), out_dtype),
        grid_spec=pltpu.PrefetchScalarGridSpec(
            num_scalar_prefetch=0,
            grid=grid,
            in_specs=in_specs,
            out_specs=pl.BlockSpec((tm, tn), lambda i, j, k: (i, j)),
            scratch_shapes=[pltpu.VMEM((tm, tn), jnp.float32)],
        ),
        compiler_params=pltpu.CompilerParams(
            dimension_semantics=("parallel", "parallel", "arbitrary"),
            vmem_limit_bytes=VMEM_LIMIT),
        cost_estimate=cost,
    )(*inputs)
    return out[:M] if Mp != M else out


# ----------------------------------------------------------------------------
# Pallas kernel 2: direct 3x3 (dilated, stride-1, "same") convolution.
#   The padded activation is flattened to a (rows*cols, C) slab; every tap
#   (kh, kw) is then a constant 1-D shift of that slab, so no im2col matrix
#   is ever written to HBM.  Grid = (batch, cout-tile, cin-chunk).
# ----------------------------------------------------------------------------
def _conv3x3_kernel(x_ref, w_ref, s_ref, b_ref, o_ref, acc_ref, *,
                    Q, Wp, d, relu):
    kk = pl.program_id(2)

    @pl.when(kk == 0)
    def _():
        acc_ref[...] = jnp.zeros_like(acc_ref)

    x = x_ref[0]                      # (L, tk) bf16 flattened padded slab
    acc = acc_ref[...]
    for kh in range(3):
        for kw in range(3):
            sh = (kh * Wp + kw) * d   # static element shift for this tap
            win = x[sh:sh + Q, :]
            acc = acc + jnp.dot(win, w_ref[kh * 3 + kw],
                                preferred_element_type=jnp.float32)
    acc_ref[...] = acc

    @pl.when(kk == pl.num_programs(2) - 1)
    def _():
        y = acc_ref[...] * s_ref[...] + b_ref[...]
        if relu:
            y = jnp.maximum(y, 0.0)
        o_ref[0] = y.astype(o_ref.dtype)


def _direct_conv_plan(H, W, C, Np, d):
    Wp = W + 2 * d
    L = (H + 2 * d + 1) * Wp
    Q = H * Wp
    if C <= 1024:
        tk = C
    elif C % 512 == 0:
        tk = 512
    else:
        return None
    tn = _pick_tn(Np)
    vmem = (2 * L * tk * 2 + 2 * 9 * tk * tn * 2 + 2 * Q * tn * 2
            + Q * tn * 4 + 4 * tn * 4)
    if vmem > DIRECT_CONV_VMEM_BUDGET:
        return None
    return dict(Wp=Wp, L=L, Q=Q, tk=tk, tn=tn)


def conv3x3_direct(x, p, plan, *, dilation, relu, out_dtype=jnp.bfloat16):
    N, H, W, C = x.shape
    d = dilation
    Wp, L, Q, tk, tn = plan["Wp"], plan["L"], plan["Q"], plan["tk"], plan["tn"]
    w = p["w"]                         # (9, C, Np) bf16 (pre-padded at init)
    Np = w.shape[-1]

    # pad: d rows top, d+1 rows bottom (guard row), d cols each side; flatten
    # rows x cols so every tap is a constant in-VMEM shift of the slab.
    xpd = jnp.pad(x.astype(jnp.bfloat16), ((0, 0), (d, d + 1), (d, d), (0, 0)))
    x2 = xpd.reshape(N, L, C)

    grid = (N, Np // tn, C // tk)
    cost = pl.CostEstimate(
        flops=2 * 9 * N * Q * C * Np,
        transcendentals=0,
        bytes_accessed=N * L * C * 2 * (Np // tn) + 9 * C * Np * 2
        + N * Q * Np * 2)

    out = pl.pallas_call(
        functools.partial(_conv3x3_kernel, Q=Q, Wp=Wp, d=d, relu=relu),
        out_shape=jax.ShapeDtypeStruct((N, Q, Np), out_dtype),
        grid_spec=pltpu.PrefetchScalarGridSpec(
            num_scalar_prefetch=0,
            grid=grid,
            in_specs=[
                pl.BlockSpec((1, L, tk), lambda n, j, k: (n, 0, k)),
                pl.BlockSpec((9, tk, tn), lambda n, j, k: (0, k, j)),
                pl.BlockSpec((1, tn), lambda n, j, k: (0, j)),
                pl.BlockSpec((1, tn), lambda n, j, k: (0, j)),
            ],
            out_specs=pl.BlockSpec((1, Q, tn), lambda n, j, k: (n, 0, j)),
            scratch_shapes=[pltpu.VMEM((Q, tn), jnp.float32)],
        ),
        compiler_params=pltpu.CompilerParams(
            dimension_semantics=("parallel", "parallel", "arbitrary"),
            vmem_limit_bytes=VMEM_LIMIT),
        cost_estimate=cost,
    )(x2, w, p["scale"], p["bias"])

    out = out.reshape(N, H, Wp, Np)
    return out[:, :, :W, :p["cout"]]


# ----------------------------------------------------------------------------
# Conv (+folded BN, + optional fused residual / ReLU) dispatcher.
# ----------------------------------------------------------------------------
def conv_bn(x, p, *, stride=1, padding=0, dilation=1, relu=False,
            res=None, out_dtype=jnp.bfloat16):
    k = p["k"]
    N, H, W, C = x.shape
    assert C == p["cin"]
    cout, Np = p["cout"], p["w"].shape[-1]

    if k == 1:
        if stride > 1:
            x = x[:, ::stride, ::stride, :]
        N, Ho, Wo, _ = x.shape
        M = N * Ho * Wo
        rf = res.reshape(M, res.shape[-1]) if res is not None else None
        y = matmul_affine(x.reshape(M, C), p["w"], p["scale"], p["bias"],
                          relu=relu, res=rf, out_dtype=out_dtype)
        if cout != Np:
            y = y[:, :cout]
        return y.reshape(N, Ho, Wo, cout)

    # k == 3
    assert res is None
    if stride == 1 and padding == dilation:
        plan = _direct_conv_plan(H, W, C, Np, dilation)
        if plan is not None:
            return conv3x3_direct(x, p, plan, dilation=dilation, relu=relu,
                                  out_dtype=out_dtype)

    # TODO(synk): very large spatial maps fall back to bf16 im2col; a
    # row-blocked direct kernel (halo via manual DMA) would remove this too.
    d = dilation
    xpd = jnp.pad(x.astype(jnp.bfloat16),
                  ((0, 0), (padding, padding), (padding, padding), (0, 0)))
    Ho = (H + 2 * padding - d * (k - 1) - 1) // stride + 1
    Wo = (W + 2 * padding - d * (k - 1) - 1) // stride + 1
    cols = []
    for i in range(k):
        for j in range(k):
            r0, c0 = i * d, j * d
            cols.append(jax.lax.slice(
                xpd, (0, r0, c0, 0),
                (N, r0 + (Ho - 1) * stride + 1, c0 + (Wo - 1) * stride + 1, C),
                (1, stride, stride, 1)))
    patches = jnp.concatenate(cols, axis=-1).reshape(N * Ho * Wo, k * k * C)
    y = matmul_affine(patches, p["w"].reshape(k * k * C, Np),
                      p["scale"], p["bias"], relu=relu, out_dtype=out_dtype)
    if cout != Np:
        y = y[:, :cout]
    return y.reshape(N, Ho, Wo, cout)


# ----------------------------------------------------------------------------
# Glue ops (plain JAX, fused by XLA): maxpool as a 9-tap running max,
# adaptive average pooling bins, align_corners bilinear upsample.
# ----------------------------------------------------------------------------
def maxpool_3x3_s2_p1(x):
    N, H, W, C = x.shape
    xp = jnp.pad(x, ((0, 0), (1, 1), (1, 1), (0, 0)),
                 constant_values=float("-inf"))
    Ho = (H + 2 - 3) // 2 + 1
    Wo = (W + 2 - 3) // 2 + 1
    out = None
    for i in range(3):
        for j in range(3):
            s = jax.lax.slice(
                xp, (0, i, j, 0),
                (N, i + (Ho - 1) * 2 + 1, j + (Wo - 1) * 2 + 1, C),
                (1, 2, 2, 1))
            out = s if out is None else jnp.maximum(out, s)
    return out


def adaptive_avg_pool(x, p):
    N, H, W, C = x.shape
    xf = x.astype(jnp.float32)
    rows = []
    for i in range(p):
        r0, r1 = (i * H) // p, -(-((i + 1) * H) // p)
        cols = []
        for j in range(p):
            c0, c1 = (j * W) // p, -(-((j + 1) * W) // p)
            cols.append(jnp.mean(xf[:, r0:r1, c0:c1, :], axis=(1, 2)))
        rows.append(jnp.stack(cols, axis=1))
    return jnp.stack(rows, axis=1)          # (N, p, p, C) f32


def upsample_bilinear_ac(x, Ho, Wo):
    N, H, W, C = x.shape
    xf = x.astype(jnp.float32)

    def grid(out, inn):
        if inn == 1:
            z = jnp.zeros((out,), jnp.int32)
            return z, z, jnp.zeros((out,), jnp.float32)
        s = jnp.arange(out, dtype=jnp.float32) * (inn - 1) / (out - 1)
        lo = jnp.floor(s).astype(jnp.int32)
        hi = jnp.minimum(lo + 1, inn - 1)
        return lo, hi, s - lo.astype(jnp.float32)

    h0, h1, fh = grid(Ho, H)
    w0, w1, fw = grid(Wo, W)

    def lerp_w(xr):
        a, b = xr[:, :, w0], xr[:, :, w1]
        return a * (1 - fw)[None, None, :, None] + b * fw[None, None, :, None]

    top, bot = lerp_w(xf[:, h0]), lerp_w(xf[:, h1])
    out = top * (1 - fh)[None, :, None, None] + bot * fh[None, :, None, None]
    return out.astype(jnp.bfloat16)


# ----------------------------------------------------------------------------
# Deterministic parameter construction (synthetic weights, BN folded, packed).
# ----------------------------------------------------------------------------
class KeyStream:
    def __init__(self, seed):
        self.key = jax.random.PRNGKey(seed)

    def __call__(self):
        self.key, sub = jax.random.split(self.key)
        return sub


def init_conv_bn(nk, cin, cout, k, *, with_bn=True, conv_bias=False):
    coutp = _round_up(cout, 128)
    fan_in = cin * k * k
    if k == 1:
        w = jax.random.normal(nk(), (cin, cout), jnp.float32) * (2.0 / fan_in) ** 0.5
        wpad = ((0, 0), (0, coutp - cout))
    else:
        w = jax.random.normal(nk(), (k * k, cin, cout), jnp.float32) * (2.0 / fan_in) ** 0.5
        wpad = ((0, 0), (0, 0), (0, coutp - cout))
    if with_bn:
        gamma = 1.0 + 0.1 * jax.random.normal(nk(), (cout,), jnp.float32)
        beta = 0.1 * jax.random.normal(nk(), (cout,), jnp.float32)
        mean = 0.1 * jax.random.normal(nk(), (cout,), jnp.float32)
        var = 1.0 + 0.1 * jax.random.uniform(nk(), (cout,), jnp.float32)
        scale = gamma / jnp.sqrt(var + 1e-5)
        bias = beta - mean * scale
    else:
        scale = jnp.ones((cout,), jnp.float32)
        bias = (0.1 * jax.random.normal(nk(), (cout,), jnp.float32)
                if conv_bias else jnp.zeros((cout,), jnp.float32))
    return dict(
        w=jnp.pad(w, wpad).astype(jnp.bfloat16),
        scale=jnp.pad(scale, (0, coutp - cout)).reshape(1, coutp),
        bias=jnp.pad(bias, (0, coutp - cout)).reshape(1, coutp),
        k=k, cin=cin, cout=cout)


def init_bottleneck(nk, cin, mid, cout, downsample):
    p = dict(reduce=init_conv_bn(nk, cin, mid, 1),
             conv3x3=init_conv_bn(nk, mid, mid, 3),
             increase=init_conv_bn(nk, mid, cout, 1))
    if downsample:
        p["proj"] = init_conv_bn(nk, cin, cout, 1)
    return p


def init_resblock(nk, n, cin, mid, cout):
    blocks = [init_bottleneck(nk, cin, mid, cout, True)]
    for _ in range(n - 1):
        blocks.append(init_bottleneck(nk, cout, mid, cout, False))
    return blocks


def init_pspnet(seed, n_blocks, pyramids, n_classes):
    nk = KeyStream(seed)
    p = {}
    p["layer1"] = [init_conv_bn(nk, 3, 64, 3),
                   init_conv_bn(nk, 64, 64, 3),
                   init_conv_bn(nk, 64, 128, 3)]
    p["layer2"] = init_resblock(nk, n_blocks[0], 128, 64, 256)
    p["layer3"] = init_resblock(nk, n_blocks[1], 256, 128, 512)
    p["layer4"] = init_resblock(nk, n_blocks[2], 512, 256, 1024)
    p["layer5"] = init_resblock(nk, n_blocks[3], 1024, 512, 2048)
    out_ch = 2048 // len(pyramids)
    p["ppm"] = [init_conv_bn(nk, 2048, out_ch, 1) for _ in pyramids]
    p["final"] = init_conv_bn(nk, 4096, 512, 3)
    p["conv6"] = init_conv_bn(nk, 512, n_classes, 1, with_bn=False, conv_bias=True)
    return p


# ----------------------------------------------------------------------------
# Forward pass (eval mode)
# ----------------------------------------------------------------------------
def bottleneck_fwd(x, p, stride, dilation, downsample):
    h = conv_bn(x, p["reduce"], stride=stride, padding=0, dilation=1, relu=True)
    h = conv_bn(h, p["conv3x3"], stride=1, padding=dilation, dilation=dilation,
                relu=True)
    if downsample:
        sc = conv_bn(x, p["proj"], stride=stride, padding=0, dilation=1,
                     relu=False)
    else:
        sc = x
    # residual add + ReLU fused into the 'increase' 1x1 conv epilogue
    return conv_bn(h, p["increase"], stride=1, padding=0, dilation=1,
                   relu=True, res=sc)


def resblock_fwd(x, blocks, stride, dilation):
    h = bottleneck_fwd(x, blocks[0], stride, dilation, True)
    for b in blocks[1:]:
        h = bottleneck_fwd(h, b, 1, dilation, False)
    return h


def pspnet_forward(x_nchw, params, pyramids):
    x = jnp.transpose(x_nchw, (0, 2, 3, 1)).astype(jnp.bfloat16)  # NCHW -> NHWC

    # _DilatedFCN
    h = conv_bn(x, params["layer1"][0], stride=2, padding=1, dilation=1, relu=True)
    h = conv_bn(h, params["layer1"][1], stride=1, padding=1, dilation=1, relu=True)
    h = conv_bn(h, params["layer1"][2], stride=1, padding=1, dilation=1, relu=True)
    h = maxpool_3x3_s2_p1(h)
    h = resblock_fwd(h, params["layer2"], stride=1, dilation=1)
    h = resblock_fwd(h, params["layer3"], stride=2, dilation=1)
    h = resblock_fwd(h, params["layer4"], stride=1, dilation=2)
    h = resblock_fwd(h, params["layer5"], stride=1, dilation=4)

    # _PyramidPoolModule
    hs = [h]
    H, W = h.shape[1], h.shape[2]
    for p_sz, pp in zip(pyramids, params["ppm"]):
        g = adaptive_avg_pool(h, p_sz)
        g = conv_bn(g, pp, relu=True)
        g = upsample_bilinear_ac(g, H, W)
        hs.append(g)
    h = jnp.concatenate(hs, axis=-1)

    # final (conv5_4, BN, no relu) ; Dropout2d identity in eval mode.
    # conv6relu is fused into this conv's epilogue (h_feat is not returned
    # when output_features=False / output_all=False).
    h = conv_bn(h, params["final"], stride=1, padding=1, dilation=1, relu=True)
    # conv6: 1x1 conv with bias -> f32 logits
    h = conv_bn(h, params["conv6"], stride=1, padding=0, dilation=1,
                relu=False, out_dtype=jnp.float32)
    return jnp.transpose(h, (0, 3, 1, 2))  # back to NCHW logits


# ----------------------------------------------------------------------------
if __name__ == "__main__":
    # Small, architecture-consistent configuration: channel widths are the
    # hardcoded PSPNet ones (3->64->128->...->2048->4096->512->n_classes);
    # n_blocks / pyramids / input_size / n_classes are constructor args and
    # are shrunk for a fast synthetic run.
    N_BLOCKS = [1, 1, 1, 1]
    PYRAMIDS = [2, 1]          # out_channels = 2048 // 2 -> concat is still 4096
    N_CLASSES = 8
    INPUT_HW = 32              # logits come out at 32/8 = 4

    params = init_pspnet(seed=0, n_blocks=N_BLOCKS, pyramids=PYRAMIDS,
                         n_classes=N_CLASSES)

    x = jax.random.normal(jax.random.PRNGKey(0), (1, 3, INPUT_HW, INPUT_HW),
                          jnp.float32)

    out = pspnet_forward(x, params, PYRAMIDS)
    out = jax.block_until_ready(out)

    assert out.shape == (1, N_CLASSES, INPUT_HW // 8, INPUT_HW // 8), out.shape
    assert bool(jnp.all(jnp.isfinite(out)))
    print("KERNEL_OK")
</pallas_src>

<mosaic_0001>
module attributes {stable_mosaic.version = 11 : i64} {
  func.func @_mm_affine_kernel(%arg0: i32, %arg1: i32, %arg2: i32, %arg3: memref<256x128xbf16, #tpu.memory_space<vmem>>, %arg4: memref<128x128xbf16, #tpu.memory_space<vmem>>, %arg5: memref<1x128xf32, #tpu.memory_space<vmem>>, %arg6: memref<1x128xf32, #tpu.memory_space<vmem>>, %arg7: memref<256x128xbf16, #tpu.memory_space<vmem>>, %arg8: memref<256x128xf32, #tpu.memory_space<vmem>>) attributes {dimension_semantics = [#tpu.dimension_semantics<parallel>, #tpu.dimension_semantics<parallel>, #tpu.dimension_semantics<arbitrary>], iteration_bounds = array<i64: 1, 1, 1>, scalar_prefetch = 0 : i64, scratch_operands = 1 : i64, tpu.core_type = #tpu.core_type<tc>, window_params = [{transform_indices = @transform_0, window_bounds = array<i64: 256, 128>}, {transform_indices = @transform_1, window_bounds = array<i64: 128, 128>}, {transform_indices = @transform_2, window_bounds = array<i64: 1, 128>}, {transform_indices = @transform_3, window_bounds = array<i64: 1, 128>}, {transform_indices = @transform_4, window_bounds = array<i64: 256, 128>}]} {
    %c0_i32 = arith.constant 0 : i32
    %0 = arith.cmpi eq, %arg2, %c0_i32 : i32
    %1 = arith.extui %0 : i1 to i32
    %c0_i32_0 = arith.constant 0 : i32
    %2 = arith.cmpi ne, %1, %c0_i32_0 : i32
    scf.if %2 {
      %cst_10 = arith.constant 0.000000e+00 : f32
      %12 = vector.broadcast %cst_10 : f32 to vector<256x128xf32>
      %c0_11 = arith.constant 0 : index
      %c0_12 = arith.constant 0 : index
      %13 = vector.load %arg8[%c0_11, %c0_12] : memref<256x128xf32, #tpu.memory_space<vmem>>, vector<256x128xf32>
      tpu.vector_store %arg8[%c0_11, %c0_12], %12 {strides = array<i32>} : memref<256x128xf32, #tpu.memory_space<vmem>>, vector<256x128xf32>,
    } else {
    }
    %c0 = arith.constant 0 : index
    %c0_1 = arith.constant 0 : index
    %3 = vector.load %arg8[%c0, %c0_1] : memref<256x128xf32, #tpu.memory_space<vmem>>, vector<256x128xf32>
    %c0_2 = arith.constant 0 : index
    %c0_3 = arith.constant 0 : index
    %4 = vector.load %arg3[%c0_2, %c0_3] : memref<256x128xbf16, #tpu.memory_space<vmem>>, vector<256x128xbf16>
    %c0_4 = arith.constant 0 : index
    %c0_5 = arith.constant 0 : index
    %5 = vector.load %arg4[%c0_4, %c0_5] : memref<128x128xbf16, #tpu.memory_space<vmem>>, vector<128x128xbf16>
    %cst = arith.constant dense<0.000000e+00> : vector<256x128xf32>
    %6 = tpu.matmul %4, %5, %cst {dimension_numbers = #tpu.dot_dimension_numbers<[1], [0], [0], [1], [0, 0, 1, 1], [], []>} : vector<256x128xbf16>, vector<128x128xbf16>, vector<256x128xf32> -> vector<256x128xf32>
    %7 = arith.addf %3, %6 : vector<256x128xf32>
    %c0_6 = arith.constant 0 : index
    %c0_7 = arith.constant 0 : index
    %8 = vector.load %arg8[%c0_6, %c0_7] : memref<256x128xf32, #tpu.memory_space<vmem>>, vector<256x128xf32>
    tpu.vector_store %arg8[%c0_6, %c0_7], %7 {strides = array<i32>} : memref<256x128xf32, #tpu.memory_space<vmem>>, vector<256x128xf32>,
    %c0_i32_8 = arith.constant 0 : i32
    %9 = arith.cmpi eq, %arg2, %c0_i32_8 : i32
    %10 = arith.extui %9 : i1 to i32
    %c0_i32_9 = arith.constant 0 : i32
    %11 = arith.cmpi ne, %10, %c0_i32_9 : i32
    scf.if %11 {
      %c0_10 = arith.constant 0 : index
      %c0_11 = arith.constant 0 : index
      %12 = vector.load %arg8[%c0_10, %c0_11] : memref<256x128xf32, #tpu.memory_space<vmem>>, vector<256x128xf32>
      %c0_12 = arith.constant 0 : index
      %c0_13 = arith.constant 0 : index
      %13 = vector.load %arg5[%c0_12, %c0_13] : memref<1x128xf32, #tpu.memory_space<vmem>>, vector<1x128xf32>
      %14 = vector.broadcast %13 : vector<1x128xf32> to vector<256x128xf32>
      %15 = arith.mulf %12, %14 : vector<256x128xf32>
      %c0_14 = arith.constant 0 : index
      %c0_15 = arith.constant 0 : index
      %16 = vector.load %arg6[%c0_14, %c0_15] : memref<1x128xf32, #tpu.memory_space<vmem>>, vector<1x128xf32>
      %17 = vector.broadcast %16 : vector<1x128xf32> to vector<256x128xf32>
      %18 = arith.addf %15, %17 : vector<256x128xf32>
      %cst_16 = arith.constant 0.000000e+00 : f32
      %19 = vector.broadcast %cst_16 : f32 to vector<256x128xf32>
      %20 = arith.maximumf %18, %19 : vector<256x128xf32>
      %21 = arith.truncf %20 : vector<256x128xf32> to vector<256x128xbf16>
      %c0_17 = arith.constant 0 : index
      %c0_18 = arith.constant 0 : index
      %22 = vector.load %arg7[%c0_17, %c0_18] : memref<256x128xbf16, #tpu.memory_space<vmem>>, vector<256x128xbf16>
      tpu.vector_store %arg7[%c0_17, %c0_18], %21 {strides = array<i32>} : memref<256x128xbf16, #tpu.memory_space<vmem>>, vector<256x128xbf16>,
    } else {
    }
    return
  }
  func.func @transform_0(%arg0: i32, %arg1: i32, %arg2: i32) -> (i32, i32) {
    %c0_i32 = arith.constant 0 : i32
    return %arg0, %arg2 : i32, i32
  }
  func.func @transform_1(%arg0: i32, %arg1: i32, %arg2: i32) -> (i32, i32) {
    %c0_i32 = arith.constant 0 : i32
    return %arg2, %arg1 : i32, i32
  }
  func.func @transform_2(%arg0: i32, %arg1: i32, %arg2: i32) -> (i32, i32) {
    %c0_i32 = arith.constant 0 : i32
    %c0_i32_0 = arith.constant 0 : i32
    return %c0_i32, %arg1 : i32, i32
  }
  func.func @transform_3(%arg0: i32, %arg1: i32, %arg2: i32) -> (i32, i32) {
    %c0_i32 = arith.constant 0 : i32
    %c0_i32_0 = arith.constant 0 : i32
    return %c0_i32, %arg1 : i32, i32
  }
  func.func @transform_4(%arg0: i32, %arg1: i32, %arg2: i32) -> (i32, i32) {
    %c0_i32 = arith.constant 0 : i32
    return %arg0, %arg1 : i32, i32
  }
}

</mosaic_0001>

<bundles_post_ra>
// kernel: tpu_custom_call.1
= control target key start
LH: loop header
LB: loop body
LE: loop exit
PB: predicated region body
PF: predicated region fallthrough
CT: control target
= control target key end

     0   :  { %9 = vsyncpa [#allocation4], 0  ;;  %s1378_s0 = inlined_call_operand.hbm [shape: bf16[256,128], index: 0, kind: input, shape index: {}]   ;;  %s1379_s1 = inlined_call_operand.hbm [shape: bf16[128,128], index: 1, kind: input, shape index: {}]   ;;  %s1380_s2 = inlined_call_operand.vmem [shape: f32[1,128], index: 2, kind: input, shape index: {}]   ;;  %s1381_s3 = inlined_call_operand.vmem [shape: f32[1,128], index: 3, kind: input, shape index: {}]   ;;  %s1382_s4 = inlined_call_operand.hbm [shape: bf16[256,128], index: 4, kind: output, shape index: {}]  }
   0x1   :  { %10 = vsyncpa [#allocation7], 0 }
   0x2   :  { %11 = vsyncpa [#allocation5], 0  ;;  %s1229_s15 = smov [#allocation3]   ;;  %s1157_s19 = scalar_lea.hbm %s1378_s0, 2048 }
   0x3   :  { %s17_s16 = sshll.u32 %s1229_s15, 4  ;;  %p1158_p0 = scmp.ne.s32.totalorder %s1378_s0, %s1157_s19  ;;  %s18_s16 = int_to_ptr.vmem [resolvable:$true] %s17_s16 }
   0x4   :  { %p1161_p1 = scmp.lt.u32.totalorder %s1157_s19, %s1378_s0 }
   0x6   :  { %p1163_p2 = pnand %p1161_p1, %p1158_p0 }
   0x8   :  { %1166 = shalt.err (!%p1163_p2)
}
   0x9   :  { %s1167_s24 = scalar_lea.vmem %s18_s16, 2048  ;;  %p1172_p4 = scmp.lt.s32.totalorder %s18_s16, %s18_s16 }
   0xa   :  { %p1168_p3 = scmp.ne.s32.totalorder %s18_s16, %s1167_s24  ;;  %p1173_p5 = scmp.lt.s32.totalorder %s1167_s24, %s1167_s24 }
   0xc   :  { %p1174_p6 = por %p1173_p5, %p1172_p4 }
   0xe   :  { %p1175_p7 = pnand %p1174_p6, %p1168_p3 }
  0x10   :  { %1178 = shalt.err (!%p1175_p7)
}
  0x11   :  { %s1230_s25 = smov 64   ;;  %s1231_s26 = smov 4  }
  0x12   :  { %23 = dma.hbm_to_vmem [thread:$0]  %s1378_s0, 2048, %s18_s16, [#allocation4], %s1230_s25, %s1230_s25, %s1231_s26  }
  0x13   :  { %s1232_s29 = smov [#allocation6]   ;;  %s1179_s7 = scalar_lea.hbm %s1379_s1, 1024 }
  0x14   :  { %s29_s30 = sshll.u32 %s1232_s29, 4  ;;  %p1180_p8 = scmp.ne.s32.totalorder %s1379_s1, %s1179_s7  ;;  %s30_s30 = int_to_ptr.vmem [resolvable:$true] %s29_s30 }
  0x15   :  { %p1183_p9 = scmp.lt.u32.totalorder %s1179_s7, %s1379_s1 }
  0x17   :  { %p1185_p10 = pnand %p1183_p9, %p1180_p8 }
  0x19   :  { %1188 = shalt.err (!%p1185_p10)
}
  0x1a   :  { %s1189_s12 = scalar_lea.vmem %s30_s30, 1024  ;;  %p1194_p12 = scmp.lt.s32.totalorder %s30_s30, %s30_s30 }
  0x1b   :  { %p1190_p11 = scmp.ne.s32.totalorder %s30_s30, %s1189_s12  ;;  %p1195_p13 = scmp.lt.s32.totalorder %s1189_s12, %s1189_s12 }
  0x1d   :  { %p1196_p0 = por %p1195_p13, %p1194_p12 }
  0x1f   :  { %p1197_p1 = pnand %p1196_p0, %p1190_p11 }
  0x21   :  { %1200 = shalt.err (!%p1197_p1)
}
  0x22   :  { %35 = dma.hbm_to_vmem [thread:$0]  %s1379_s1, 1024, %s30_s30, [#allocation7], %s1230_s25, %s1230_s25, %s1231_s26  }
  0x23   :  { %1223 = dma.done.wait [#allocation4], 2048  }
  0x24   :  { %1224 = vsyncadd [#allocation4], 4294965248 }
  0x25   :  { %1225 = dma.done.wait [#allocation7], 1024  }
  0x26   :  { %1226 = vsyncadd [#allocation7], 4294966272  ;;  %v1133_v0 = vld [vmem:[#allocation6] sm:$0xff]   ;;  %v1134_v1 = vld [vmem:[#allocation6 + $0x8] sm:$0xff]  }
  0x27   :  { %1064 = vmatprep.subr.bf16.mxu0 %v1133_v0  ;;  %1112 = vmatprep.subr.bf16.mxu1 %v1133_v0  ;;  %v1135_v2 = vld [vmem:[#allocation6 + $0x10] sm:$0xff]   ;;  %v1136_v3 = vld [vmem:[#allocation6 + $0x18] sm:$0xff]   ;;  %v1141_v4 = vld [vmem:[#allocation3] sm:$0xff]  }
  0x28   :  { %1065 = vmatpush3.bf16.msra.mxu0 %v1133_v0  ;;  %1120 = vmatpush3.bf16.msra.mxu1 %v1133_v0  ;;  %v1142_v5 = vld [vmem:[#allocation3 + $0x40] sm:$0xff]   ;;  %v1138_v7 = vld [vmem:[#allocation6 + $0x28] sm:$0xff]   ;;  %v1139_v8 = vld [vmem:[#allocation6 + $0x30] sm:$0xff]  }
  0x29   :  { %1066 = vmatprep.subr.bf16.mxu0 %v1134_v1  ;;  %1113 = vmatprep.subr.bf16.mxu1 %v1134_v1  ;;  %v1137_v6 = vld [vmem:[#allocation6 + $0x20] sm:$0xff]   ;;  %v1140_v9 = vld [vmem:[#allocation6 + $0x38] sm:$0xff]   ;;  %v1143_v10 = vld [vmem:[#allocation3 + $0x8] sm:$0xff]  }
  0x2a   :  { %1080 = vmatprep.mubr.bf16.mxu0 %v1141_v4  ;;  %1096 = vmatprep.mubr.bf16.mxu1 %v1142_v5  ;;  %v1144_v11 = vld [vmem:[#allocation3 + $0x48] sm:$0xff]   ;;  %v1145_v12 = vld [vmem:[#allocation3 + $0x10] sm:$0xff]   ;;  %v1147_v14 = vld [vmem:[#allocation3 + $0x18] sm:$0xff]  }
  0x2b   :  { %v1146_v13 = vld [vmem:[#allocation3 + $0x50] sm:$0xff]   ;;  %v1148_v15 = vld [vmem:[#allocation3 + $0x58] sm:$0xff]   ;;  %v1149_v16 = vld [vmem:[#allocation3 + $0x20] sm:$0xff]  }
  0x2c   :  { %1067 = vmatpush3.bf16.msra.mxu0 %v1134_v1  ;;  %1121 = vmatpush3.bf16.msra.mxu1 %v1134_v1  ;;  %v1150_v17 = vld [vmem:[#allocation3 + $0x60] sm:$0xff]   ;;  %v1151_v18 = vld [vmem:[#allocation3 + $0x28] sm:$0xff]   ;;  %v1153_v20 = vld [vmem:[#allocation3 + $0x30] sm:$0xff]  }
  0x2d   :  { %1068 = vmatprep.subr.bf16.mxu0 %v1135_v2  ;;  %1114 = vmatprep.subr.bf16.mxu1 %v1135_v2  ;;  %v1152_v19 = vld [vmem:[#allocation3 + $0x68] sm:$0xff]   ;;  %v1154_v21 = vld [vmem:[#allocation3 + $0x70] sm:$0xff]   ;;  %v1155_v22 = vld [vmem:[#allocation3 + $0x38] sm:$0xff]  }
  0x2e   :  { %v1156_v23 = vld [vmem:[#allocation3 + $0x78] sm:$0xff]   ;;  %v1292_v24 = vld [vmem:[%s1380_s2] ss:$0 sm:$0xff]  ;;  %s1233_s2 = smov [#allocation8]  }
  0x2f   :  { %v1297_v26 = vld [vmem:[%s1381_s3] ss:$0 sm:$0xff]  ;;  %s842_s3 = sshll.u32 %s1233_s2, 4  ;;  %s843_s3 = int_to_ptr.vmem [resolvable:$true] %s842_s3 }
  0x30   :  { %1069 = vmatpush3.bf16.msra.mxu0 %v1135_v2  ;;  %1122 = vmatpush3.bf16.msra.mxu1 %v1135_v2  ;;  %s1201_s17 = scalar_lea.vmem %s843_s3, 2048  ;;  %p1206_p3 = scmp.lt.s32.totalorder %s843_s3, %s843_s3 }
  0x31   :  { %1070 = vmatprep.subr.bf16.mxu0 %v1136_v3  ;;  %1115 = vmatprep.subr.bf16.mxu1 %v1136_v3  ;;  %p1202_p2 = scmp.ne.s32.totalorder %s843_s3, %s1201_s17  ;;  %p1207_p4 = scmp.lt.s32.totalorder %s1201_s17, %s1201_s17 }
  0x33   :  { %p1208_p5 = por %p1207_p4, %p1206_p3 }
  0x34   :  { %1071 = vmatpush3.bf16.msra.mxu0 %v1136_v3  ;;  %1123 = vmatpush3.bf16.msra.mxu1 %v1136_v3 }
  0x35   :  { %1072 = vmatprep.subr.bf16.mxu0 %v1137_v6  ;;  %1116 = vmatprep.subr.bf16.mxu1 %v1137_v6  ;;  %p1209_p6 = pnand %p1208_p5, %p1202_p2 }
  0x38   :  { %1073 = vmatpush3.bf16.msra.mxu0 %v1137_v6  ;;  %1124 = vmatpush3.bf16.msra.mxu1 %v1137_v6 }
  0x39   :  { %1074 = vmatprep.subr.bf16.mxu0 %v1138_v7  ;;  %1117 = vmatprep.subr.bf16.mxu1 %v1138_v7 }
  0x3c   :  { %1075 = vmatpush3.bf16.msra.mxu0 %v1138_v7  ;;  %1125 = vmatpush3.bf16.msra.mxu1 %v1138_v7 }
  0x3d   :  { %1076 = vmatprep.subr.bf16.mxu0 %v1139_v8  ;;  %1118 = vmatprep.subr.bf16.mxu1 %v1139_v8 }
  0x40   :  { %1077 = vmatpush3.bf16.msra.mxu0 %v1139_v8  ;;  %1126 = vmatpush3.bf16.msra.mxu1 %v1139_v8 }
  0x41   :  { %1078 = vmatprep.subr.bf16.mxu0 %v1140_v9  ;;  %1119 = vmatprep.subr.bf16.mxu1 %v1140_v9 }
  0x44   :  { %1079 = vmatpush3.bf16.msra.mxu0 %v1140_v9  ;;  %1127 = vmatpush3.bf16.msra.mxu1 %v1140_v9 }
  0x47   :  { %1081 = vmatmul.mubr.bf16.vlgmr.msra.gmra.mrb[0].mxu0 %v1143_v10  ;;  %1097 = vmatmul.mubr.bf16.vlgmr.msra.gmra.mrb[0].mxu1 %v1144_v11 }
  0x48   :  { %1084 = vmatprep.mubr.bf16.mxu0 %v1145_v12  ;;  %1100 = vmatprep.mubr.bf16.mxu1 %v1146_v13 }
  0x4f   :  { %1085 = vmatmul.mubr.bf16.gmra.mrb[4].mxu0 %v1147_v14  ;;  %1101 = vmatmul.mubr.bf16.gmra.mrb[4].mxu1 %v1148_v15 }
  0x50   :  { %1088 = vmatprep.mubr.bf16.mxu0 %v1149_v16  ;;  %1104 = vmatprep.mubr.bf16.mxu1 %v1150_v17 }
  0x57   :  { %1089 = vmatmul.mubr.bf16.gmra.mrb[8].mxu0 %v1151_v18  ;;  %1105 = vmatmul.mubr.bf16.gmra.mrb[8].mxu1 %v1152_v19 }
  0x58   :  { %1092 = vmatprep.mubr.bf16.mxu0 %v1153_v20  ;;  %1108 = vmatprep.mubr.bf16.mxu1 %v1154_v21 }
  0x5f   :  { %1093 = vmatmul.mubr.bf16.gmra.mrb[12].mxu0 %v1155_v22  ;;  %1109 = vmatmul.mubr.bf16.gmra.mrb[12].mxu1 %v1156_v23 }
 0x11a   :  { %v1082_v25 = vpop.f32.mrb[0].mxu0  ;;  %v1098_v27 = vpop.f32.mrb[0].mxu1 }
 0x11b   :  { %v576_v28 = vmul.f32 %v1082_v25, %v1292_v24  ;;  %v592_v29 = vmul.f32 %v1098_v27, %v1292_v24  ;;  %v341_v30 = vpop.f32.mrb[1].mxu0  ;;  %v405_v31 = vpop.f32.mrb[1].mxu1 }
 0x11c   :  { %v574_v32 = vmul.f32 %v1292_v24, %v341_v30  ;;  %v590_v33 = vmul.f32 %v1292_v24, %v405_v31  ;;  %v1083_v34 = vpop.f32.mrb[2].mxu0  ;;  %v1099_v35 = vpop.f32.mrb[2].mxu1 }
 0x11d   :  { %v615_v36 = vadd.f32 %v1297_v26, %v576_v28  ;;  %v631_v37 = vadd.f32 %v1297_v26, %v592_v29  ;;  %v577_v38 = vmul.f32 %v1083_v34, %v1292_v24  ;;  %v593_v39 = vmul.f32 %v1099_v35, %v1292_v24  ;;  %v344_v40 = vpop.f32.mrb[3].mxu0  ;;  %v408_v41 = vpop.f32.mrb[3].mxu1 }
 0x11e   :  { %v613_v42 = vadd.f32 %v1297_v26, %v574_v32  ;;  %v629_v43 = vadd.f32 %v1297_v26, %v590_v33  ;;  %v575_v44 = vmul.f32 %v1292_v24, %v344_v40  ;;  %v591_v45 = vmul.f32 %v1292_v24, %v408_v41 }
 0x11f   :  { %v616_v46 = vadd.f32 %v1297_v26, %v577_v38  ;;  %v632_v47 = vadd.f32 %v1297_v26, %v593_v39  ;;  %v647_v50 = vmax.f32 %v615_v36, 0.0  ;;  %v663_v51 = vmax.f32 %v631_v37, 0.0 }
 0x120   :  { %v614_v48 = vadd.f32 %v1297_v26, %v575_v44  ;;  %v630_v49 = vadd.f32 %v1297_v26, %v591_v45  ;;  %v645_v54 = vmax.f32 %v613_v42, 0.0  ;;  %v661_v55 = vmax.f32 %v629_v43, 0.0 }
 0x121   :  { %v648_v52 = vmax.f32 %v616_v46, 0.0  ;;  %v664_v53 = vmax.f32 %v632_v47, 0.0 }
 0x122   :  { %v646_v56 = vmax.f32 %v614_v48, 0.0  ;;  %v662_v57 = vmax.f32 %v630_v49, 0.0  ;;  %v1086_v58 = vpop.f32.mrb[4].mxu0  ;;  %v1102_v59 = vpop.f32.mrb[4].mxu1 }
 0x123   :  { %v953_v60 = vpack.c.bf16 %v648_v52, %v647_v50  ;;  %v993_v61 = vpack.c.bf16 %v664_v53, %v663_v51  ;;  %v580_v62 = vmul.f32 %v1086_v58, %v1292_v24  ;;  %v596_v63 = vmul.f32 %v1102_v59, %v1292_v24  ;;  %v357_v0 = vpop.f32.mrb[5].mxu0  ;;  %v421_v1 = vpop.f32.mrb[5].mxu1 }
 0x124   :  { %v948_v2 = vpack.c.bf16 %v646_v56, %v645_v54  ;;  %v988_v3 = vpack.c.bf16 %v662_v57, %v661_v55  ;;  %v578_v4 = vmul.f32 %v1292_v24, %v357_v0  ;;  %v594_v5 = vmul.f32 %v1292_v24, %v421_v1  ;;  %v1087_v6 = vpop.f32.mrb[6].mxu0  ;;  %v1103_v7 = vpop.f32.mrb[6].mxu1 }
 0x125   :  { %1025 = vst [vmem:[#allocation8 + $0x8] sm:$0xff] %v953_v60   ;;  %1033 = vst [vmem:[#allocation8 + $0x48] sm:$0xff] %v993_v61   ;;  %v619_v8 = vadd.f32 %v1297_v26, %v580_v62  ;;  %v635_v9 = vadd.f32 %v1297_v26, %v596_v63  ;;  %v581_v10 = vmul.f32 %v1087_v6, %v1292_v24  ;;  %v360_v12 = vpop.f32.mrb[7].mxu0  ;;  %v424_v13 = vpop.f32.mrb[7].mxu1 }
 0x126   :  { %v597_v11 = vmul.f32 %v1103_v7, %v1292_v24  ;;  %949 = vst [vmem:[#allocation8] sm:$0xff] %v948_v2   ;;  %1032 = vst [vmem:[#allocation8 + $0x40] sm:$0xff] %v988_v3   ;;  %v617_v14 = vadd.f32 %v1297_v26, %v578_v4  ;;  %v633_v15 = vadd.f32 %v1297_v26, %v594_v5 }
 0x127   :  { %v579_v16 = vmul.f32 %v1292_v24, %v360_v12  ;;  %v595_v17 = vmul.f32 %v1292_v24, %v424_v13  ;;  %v620_v18 = vadd.f32 %v1297_v26, %v581_v10  ;;  %v651_v22 = vmax.f32 %v619_v8, 0.0 }
 0x128   :  { %v636_v19 = vadd.f32 %v1297_v26, %v597_v11  ;;  %v667_v23 = vmax.f32 %v635_v9, 0.0  ;;  %v649_v28 = vmax.f32 %v617_v14, 0.0  ;;  %v665_v29 = vmax.f32 %v633_v15, 0.0 }
 0x129   :  { %v618_v20 = vadd.f32 %v1297_v26, %v579_v16  ;;  %v634_v21 = vadd.f32 %v1297_v26, %v595_v17  ;;  %v652_v25 = vmax.f32 %v620_v18, 0.0 }
 0x12a   :  { %v668_v27 = vmax.f32 %v636_v19, 0.0  ;;  %v1090_v32 = vpop.f32.mrb[8].mxu0  ;;  %v1106_v33 = vpop.f32.mrb[8].mxu1 }
 0x12b   :  { %v650_v30 = vmax.f32 %v618_v20, 0.0  ;;  %v666_v31 = vmax.f32 %v634_v21, 0.0  ;;  %v963_v34 = vpack.c.bf16 %v652_v25, %v651_v22  ;;  %v584_v36 = vmul.f32 %v1090_v32, %v1292_v24  ;;  %v373_v38 = vpop.f32.mrb[9].mxu0  ;;  %v437_v39 = vpop.f32.mrb[9].mxu1 }
 0x12c   :  { %v1003_v35 = vpack.c.bf16 %v668_v27, %v667_v23  ;;  %v600_v37 = vmul.f32 %v1106_v33, %v1292_v24  ;;  %v582_v42 = vmul.f32 %v1292_v24, %v373_v38  ;;  %v598_v43 = vmul.f32 %v1292_v24, %v437_v39  ;;  %v1091_v44 = vpop.f32.mrb[10].mxu0  ;;  %v1107_v45 = vpop.f32.mrb[10].mxu1 }
 0x12d   :  { %v958_v40 = vpack.c.bf16 %v650_v30, %v649_v28  ;;  %v998_v41 = vpack.c.bf16 %v666_v31, %v665_v29  ;;  %1027 = vst [vmem:[#allocation8 + $0x18] sm:$0xff] %v963_v34   ;;  %v623_v46 = vadd.f32 %v1297_v26, %v584_v36  ;;  %v585_v48 = vmul.f32 %v1091_v44, %v1292_v24  ;;  %v376_v50 = vpop.f32.mrb[11].mxu0  ;;  %v440_v51 = vpop.f32.mrb[11].mxu1 }
 0x12e   :  { %1035 = vst [vmem:[#allocation8 + $0x58] sm:$0xff] %v1003_v35   ;;  %v639_v47 = vadd.f32 %v1297_v26, %v600_v37  ;;  %v601_v49 = vmul.f32 %v1107_v45, %v1292_v24  ;;  %v621_v52 = vadd.f32 %v1297_v26, %v582_v42  ;;  %v637_v53 = vadd.f32 %v1297_v26, %v598_v43 }
 0x12f   :  { %1026 = vst [vmem:[#allocation8 + $0x10] sm:$0xff] %v958_v40   ;;  %1034 = vst [vmem:[#allocation8 + $0x50] sm:$0xff] %v998_v41   ;;  %v583_v54 = vmul.f32 %v1292_v24, %v376_v50  ;;  %v599_v55 = vmul.f32 %v1292_v24, %v440_v51  ;;  %v624_v56 = vadd.f32 %v1297_v26, %v585_v48  ;;  %v655_v60 = vmax.f32 %v623_v46, 0.0 }
 0x130   :  { %v640_v57 = vadd.f32 %v1297_v26, %v601_v49  ;;  %v671_v61 = vmax.f32 %v639_v47, 0.0  ;;  %v653_v0 = vmax.f32 %v621_v52, 0.0  ;;  %v669_v1 = vmax.f32 %v637_v53, 0.0 }
 0x131   :  { %v622_v58 = vadd.f32 %v1297_v26, %v583_v54  ;;  %v638_v59 = vadd.f32 %v1297_v26, %v599_v55  ;;  %v656_v62 = vmax.f32 %v624_v56, 0.0 }
 0x132   :  { %v672_v63 = vmax.f32 %v640_v57, 0.0  ;;  %v1094_v4 = vpop.f32.mrb[12].mxu0  ;;  %v1110_v5 = vpop.f32.mrb[12].mxu1 }
 0x133   :  { %v654_v2 = vmax.f32 %v622_v58, 0.0  ;;  %v670_v3 = vmax.f32 %v638_v59, 0.0  ;;  %v973_v6 = vpack.c.bf16 %v656_v62, %v655_v60  ;;  %v588_v8 = vmul.f32 %v1094_v4, %v1292_v24  ;;  %v389_v10 = vpop.f32.mrb[13].mxu0  ;;  %v453_v11 = vpop.f32.mrb[13].mxu1 }
 0x134   :  { %v1013_v7 = vpack.c.bf16 %v672_v63, %v671_v61  ;;  %v604_v9 = vmul.f32 %v1110_v5, %v1292_v24  ;;  %v586_v14 = vmul.f32 %v1292_v24, %v389_v10  ;;  %v602_v15 = vmul.f32 %v1292_v24, %v453_v11  ;;  %v1095_v16 = vpop.f32.mrb[14].mxu0  ;;  %v1111_v17 = vpop.f32.mrb[14].mxu1 }
 0x135   :  { %v968_v12 = vpack.c.bf16 %v654_v2, %v653_v0  ;;  %v1008_v13 = vpack.c.bf16 %v670_v3, %v669_v1  ;;  %1029 = vst [vmem:[#allocation8 + $0x28] sm:$0xff] %v973_v6   ;;  %v627_v18 = vadd.f32 %v1297_v26, %v588_v8  ;;  %v589_v20 = vmul.f32 %v1095_v16, %v1292_v24  ;;  %v392_v22 = vpop.f32.mrb[15].mxu0  ;;  %v456_v23 = vpop.f32.mrb[15].mxu1 }
 0x136   :  { %1037 = vst [vmem:[#allocation8 + $0x68] sm:$0xff] %v1013_v7   ;;  %v643_v19 = vadd.f32 %v1297_v26, %v604_v9  ;;  %v605_v21 = vmul.f32 %v1111_v17, %v1292_v24  ;;  %v625_v25 = vadd.f32 %v1297_v26, %v586_v14  ;;  %v641_v27 = vadd.f32 %v1297_v26, %v602_v15 }
 0x137   :  { %1028 = vst [vmem:[#allocation8 + $0x20] sm:$0xff] %v968_v12   ;;  %1036 = vst [vmem:[#allocation8 + $0x60] sm:$0xff] %v1008_v13   ;;  %v587_v28 = vmul.f32 %v1292_v24, %v392_v22  ;;  %v603_v29 = vmul.f32 %v1292_v24, %v456_v23  ;;  %v628_v30 = vadd.f32 %v1297_v26, %v589_v20  ;;  %v659_v34 = vmax.f32 %v627_v18, 0.0 }
 0x138   :  { %v644_v31 = vadd.f32 %v1297_v26, %v605_v21  ;;  %v675_v35 = vmax.f32 %v643_v19, 0.0  ;;  %v657_v38 = vmax.f32 %v625_v25, 0.0  ;;  %v673_v39 = vmax.f32 %v641_v27, 0.0 }
 0x139   :  { %v626_v32 = vadd.f32 %v1297_v26, %v587_v28  ;;  %v642_v33 = vadd.f32 %v1297_v26, %v603_v29  ;;  %v660_v36 = vmax.f32 %v628_v30, 0.0 }
 0x13a   :  { %v676_v37 = vmax.f32 %v644_v31, 0.0 }
 0x13b   :  { %v658_v40 = vmax.f32 %v626_v32, 0.0  ;;  %v674_v41 = vmax.f32 %v642_v33, 0.0  ;;  %v983_v42 = vpack.c.bf16 %v660_v36, %v659_v34 }
 0x13c   :  { %v1023_v24 = vpack.c.bf16 %v676_v37, %v675_v35 }
 0x13d   :  { %v978_v43 = vpack.c.bf16 %v658_v40, %v657_v38  ;;  %v1018_v44 = vpack.c.bf16 %v674_v41, %v673_v39  ;;  %1031 = vst [vmem:[#allocation8 + $0x38] sm:$0xff] %v983_v42  }
 0x13e   :  { %1039 = vst [vmem:[#allocation8 + $0x78] sm:$0xff] %v1023_v24  }
 0x13f   :  { %1030 = vst [vmem:[#allocation8 + $0x30] sm:$0xff] %v978_v43   ;;  %1038 = vst [vmem:[#allocation8 + $0x70] sm:$0xff] %v1018_v44  }
 0x140   :  { %1212 = shalt.err (!%p1209_p6)
}
 0x141   :  { %s1213_s20 = scalar_lea.hbm %s1382_s4, 2048 }
 0x142   :  { %p1214_p7 = scmp.ne.s32.totalorder %s1382_s4, %s1213_s20  ;;  %p1217_p8 = scmp.lt.u32.totalorder %s1213_s20, %s1382_s4 }
 0x144   :  { %p1219_p9 = pnand %p1217_p8, %p1214_p7 }
 0x146   :  { %1222 = shalt.err (!%p1219_p9)
}
 0x147   :  { %848 = dma.vmem_to_hbm [thread:$0]  %s843_s3, 2048, %s1382_s4, [#allocation5], %s1230_s25, %s1230_s25, %s1231_s26  }
 0x148   :  { %1227 = dma.done.wait [#allocation5], 2048  }
 0x149   :  { %1228 = vsyncadd [#allocation5], 4294965248 }
 0x14a   :  { %852 = vsyncpa [#allocation4], 1 }
 0x14b   :  { %853 = vsyncpa [#allocation7], 1 }
 0x14c   :  { %854 = vsyncpa [#allocation5], 1 }

</bundles_post_ra>
